<compile_context>
chip_gen: v6e
topology: v6e:2x2x1
jax: 0.10.0
libtpu: 0.0.40
codegen_flags: <defaults>
</compile_context>

<pallas_src>
import functools

import jax
import jax.numpy as jnp
from jax.experimental import pallas as pl
from jax.experimental.pallas import tpu as pltpu


def _interp_matrix(out_size: int, in_size: int) -> jnp.ndarray:
    """Row-stochastic (out_size, in_size) bilinear matrix, align_corners=True."""
    if out_size == 1 or in_size == 1:
        m = jnp.zeros((out_size, in_size), dtype=jnp.float32)
        return m.at[:, 0].set(1.0)
    src = jnp.arange(out_size, dtype=jnp.float32) * (in_size - 1) / (out_size - 1)
    i0 = jnp.clip(jnp.floor(src).astype(jnp.int32), 0, in_size - 1)
    i1 = jnp.clip(i0 + 1, 0, in_size - 1)
    w1 = src - i0.astype(jnp.float32)
    w0 = 1.0 - w1
    rows = jnp.arange(out_size)
    m = jnp.zeros((out_size, in_size), dtype=jnp.float32)
    m = m.at[rows, i0].add(w0)
    m = m.at[rows, i1].add(w1)
    return m


def _nearest_matrix(out_size: int, in_size: int, scale: int) -> jnp.ndarray:
    # UpsamplingNearest2d: src = floor(i / scale)
    # TODO(synk): nearest could be a pure VPU/XLU repeat instead of one-hot matmuls.
    rows = jnp.floor(jnp.arange(out_size) / scale).astype(jnp.int32)
    rows = jnp.clip(rows, 0, in_size - 1)
    return jnp.zeros((out_size, in_size), jnp.float32).at[jnp.arange(out_size), rows].set(1.0)


def _pick_blocking(N, C_out, n, H, W, sH, sW, itemsize, max_rows=None):
    """Choose (cb output-channels per step, tsh output-rows per step, vmem limit).

    Generation-aware: big blocks on 128 MiB VMEM parts (v5e/v6e), conservative
    on v7x (64 MiB per TensorCore).  Falls back to output-row tiling when even
    a single channel does not fit the budget (huge images).
    """
    try:
        info = pltpu.get_tpu_info()
        vmem_cap = int(getattr(info, "vmem_capacity_bytes", 0)) or (64 << 20)
    except Exception:  # no TPU info available -> assume the smallest (v7x-like) part
        vmem_cap = 64 << 20
    if vmem_cap >= (96 << 20):            # v5e / v6e: 128 MiB VMEM
        target_data, vmem_budget = 8 << 20, 80 << 20
    else:                                 # v7x: 64 MiB VMEM per TensorCore
        target_data, vmem_budget = 4 << 20, 40 << 20

    def vmem_bytes(cb, tsh):
        data = cb * (n * H * W + tsh * sW) * itemsize              # pipelined in+out block
        wts = (tsh * H + W * sW) * 4                               # f32 interp matrices
        scratch = cb * (2 * H * W + 2 * tsh * H + tsh * W + tsh * sW) * 4  # f32 temps
        return 2 * data + 2 * wts + scratch

    # --- output-channel blocking (cb capped, grid-step floor) ----------------
    min_steps = min(8, N * C_out)         # >= ~4 steps per TensorCore on dual-TC parts
    cb = 1
    for c in range(1, min(C_out, 32) + 1):
        if C_out % c:
            continue
        if N * (C_out // c) < min_steps:
            continue                      # keep the pipeline / both cores fed
        if vmem_bytes(c, sH) > vmem_budget:
            continue
        if c * (n * H * W + sH * sW) * itemsize <= target_data:
            cb = c

    # --- spatial (output-row) fallback for very large images -----------------
    tsh = sH
    row_cap = sH if max_rows is None else max_rows
    if vmem_bytes(cb, sH) > vmem_budget or row_cap < sH:
        cb = 1
        cands = [t for t in range(8, sH, 8) if sH % t == 0 and t <= row_cap]
        for t in sorted(cands, reverse=True):
            tsh = t
            if vmem_bytes(1, t) <= vmem_budget:
                break

    vmem_limit = int(min(max(2 * vmem_bytes(cb, tsh), 32 << 20),
                         vmem_budget + (8 << 20)))
    return cb, tsh, vmem_limit


def _additive_upsample_kernel(x_ref, wh_ref, wwt_ref, o_ref, *, n, H):
    # x_ref:   (1, cb, n*H, W)   cb output-channel groups, n input channels each
    # wh_ref:  (tsh, H)          row-interpolation matrix block (1/n folded in)
    # wwt_ref: (W, sW)           column-interpolation matrix, transposed
    # o_ref:   (1, cb, tsh, sW)
    f32 = jnp.float32
    cb = o_ref.shape[1]

    # Channel-group sum straight from the ref (no full f32 copy of the block).
    # Slice starts k*H are sublane-aligned whenever H % 8 == 0.
    g = x_ref[0, :, 0:H, :].astype(f32)                       # (cb, H, W)
    for k in range(1, n):
        g = g + x_ref[0, :, k * H:(k + 1) * H, :].astype(f32)

    wh = wh_ref[...]                                          # (tsh, H)
    wwt = wwt_ref[...]                                        # (W, sW)
    tsh = wh.shape[0]
    W = g.shape[2]
    sW = wwt.shape[1]

    if cb == 1:
        # Plain 2-D dots for the single-channel block.
        gh = jnp.dot(wh, g[0], preferred_element_type=f32)            # (tsh, W)
        out = jnp.dot(gh, wwt, preferred_element_type=f32)            # (tsh, sW)
        o_ref[0, 0] = out.astype(o_ref.dtype)
    else:
        # Height interpolation: ONE batched contraction over all cb channels.
        wh_b = jnp.broadcast_to(wh[None], (cb, tsh, H))               # hoisted, per step
        gh = jnp.einsum("cph,chw->cpw", wh_b, g,
                        preferred_element_type=f32)                   # (cb, tsh, W)
        # Width interpolation: one flat matmul; result maps 1:1 onto the block.
        out = jnp.dot(gh.reshape(cb * tsh, W), wwt,
                      preferred_element_type=f32)                     # (cb*tsh, sW)
        o_ref[0] = out.reshape(cb, tsh, sW).astype(o_ref.dtype)       # single store


def additive_upsample2d(x, *, scale_factor: int = 2, n: int = 4, bilinear: bool = True,
                        _max_rows_per_step: int | None = None):
    N, C, H, W = x.shape
    if C % n != 0:
        raise ValueError(f"Number of input channels ({C}) must be divisible by n ({n})")
    C_out = C // n
    sH, sW = H * scale_factor, W * scale_factor
    itemsize = jnp.dtype(x.dtype).itemsize

    if bilinear:
        wh = _interp_matrix(sH, H)                  # (sH, H)
        ww = _interp_matrix(sW, W)                  # (sW, W)
    else:
        wh = _nearest_matrix(sH, H, scale_factor)
        ww = _nearest_matrix(sW, W, scale_factor)
    wh = wh * (1.0 / n)                             # fold group-mean scale into Wh
    wwt = ww.T                                      # (W, sW)

    cb, tsh, vmem_limit = _pick_blocking(N, C_out, n, H, W, sH, sW, itemsize,
                                         max_rows=_max_rows_per_step)

    # Host-side reshape (free, contiguous): one output-channel group's n input
    # channels become a contiguous (n*H, W) slab.
    x_r = x.reshape(N, C_out, n * H, W)

    # Advisory cost estimate: this kernel is HBM-bandwidth bound.
    flops = int(2 * N * C_out * sH * W * (H + sW) + N * C * H * W)
    bytes_accessed = int((N * C * H * W + N * C_out * sH * sW) * itemsize
                         + (sH * H + W * sW) * 4)
    cost = pl.CostEstimate(flops=flops, transcendentals=0,
                           bytes_accessed=bytes_accessed)

    kernel = functools.partial(_additive_upsample_kernel, n=n, H=H)

    out = pl.pallas_call(
        kernel,
        out_shape=jax.ShapeDtypeStruct((N, C_out, sH, sW), x.dtype),
        grid_spec=pltpu.PrefetchScalarGridSpec(
            num_scalar_prefetch=0,
            grid=(N, C_out // cb, sH // tsh),
            in_specs=[
                # cb output-channel groups (= cb*n input channels) per step;
                # the input block is revisited (no re-DMA) across the row axis.
                pl.BlockSpec((1, cb, n * H, W), lambda b, j, r: (b, j, 0, 0)),
                pl.BlockSpec((tsh, H), lambda b, j, r: (r, 0)),
                pl.BlockSpec((W, sW), lambda b, j, r: (0, 0)),
            ],
            out_specs=pl.BlockSpec((1, cb, tsh, sW), lambda b, j, r: (b, j, r, 0)),
        ),
        compiler_params=pltpu.CompilerParams(
            dimension_semantics=("parallel", "parallel", "arbitrary"),
            vmem_limit_bytes=vmem_limit,
        ),
        cost_estimate=cost,
    )(x_r, wh, wwt)
    return out


def _reference(x, *, scale_factor=2, n=4, bilinear=True):
    # Plain-JAX reference mirroring PyTorch order: upsample -> group mean.
    N, C, H, W = x.shape
    sH, sW = H * scale_factor, W * scale_factor
    if bilinear:
        wh = _interp_matrix(sH, H)
        ww = _interp_matrix(sW, W)
    else:
        wh = _nearest_matrix(sH, H, scale_factor)
        ww = _nearest_matrix(sW, W, scale_factor)
    up = jnp.einsum("ph,nchw->ncpw", wh, x)
    up = jnp.einsum("qw,ncpw->ncpq", ww, up)
    return up.reshape(N, C // n, n, sH, sW).mean(axis=2)


def _check(x, **kw):
    out = jax.block_until_ready(additive_upsample2d(x, **{k: v for k, v in kw.items()}))
    ref = _reference(x, **{k: v for k, v in kw.items() if not k.startswith("_")})
    assert out.shape == ref.shape, (out.shape, ref.shape)
    assert jnp.allclose(out, ref, atol=1e-5, rtol=1e-5)
    return out


if __name__ == "__main__":
    keys = jax.random.split(jax.random.PRNGKey(0), 3)

    # Case 1: primary small shape (in_channels=8, n=4 -> out_channels=2);
    # exercises the cb == 1 path.
    x1 = jax.random.normal(keys[0], (2, 8, 16, 16), dtype=jnp.float32)
    o1 = _check(x1, scale_factor=2, n=4, bilinear=True)
    assert o1.shape == (2, 2, 32, 32), o1.shape

    # Case 2: more channels -> exercises the batched (cb > 1) contraction path.
    x2 = jax.random.normal(keys[1], (2, 32, 16, 16), dtype=jnp.float32)
    _check(x2, scale_factor=2, n=4, bilinear=True)

    # Case 3: force the output-row tiling fallback path (large-image safety net).
    x3 = jax.random.normal(keys[2], (1, 4, 16, 16), dtype=jnp.float32)
    _check(x3, scale_factor=2, n=4, bilinear=True, _max_rows_per_step=8)

    # Case 4: nearest-neighbour upsampling path.
    _check(x1, scale_factor=2, n=4, bilinear=False)

    print("KERNEL_OK")
</pallas_src>

<mosaic_0001>
module attributes {stable_mosaic.version = 11 : i64} {
  func.func @_additive_upsample_kernel(%arg0: i32, %arg1: i32, %arg2: i32, %arg3: memref<1x1x64x16xf32, #tpu.memory_space<vmem>>, %arg4: memref<32x16xf32, #tpu.memory_space<vmem>>, %arg5: memref<16x32xf32, #tpu.memory_space<vmem>>, %arg6: memref<1x1x32x32xf32, #tpu.memory_space<vmem>>) attributes {dimension_semantics = [#tpu.dimension_semantics<parallel>, #tpu.dimension_semantics<parallel>, #tpu.dimension_semantics<arbitrary>], iteration_bounds = array<i64: 2, 2, 1>, scalar_prefetch = 0 : i64, scratch_operands = 0 : i64, tpu.core_type = #tpu.core_type<tc>, window_params = [{transform_indices = @transform_0, window_bounds = array<i64: 1, 1, 64, 16>}, {transform_indices = @transform_1, window_bounds = array<i64: 32, 16>}, {pipeline_mode = #tpu.pipeline_mode<synchronous>, transform_indices = @transform_2, window_bounds = array<i64: 16, 32>}, {transform_indices = @transform_3, window_bounds = array<i64: 1, 1, 32, 32>}]} {
    %c0 = arith.constant 0 : index
    %c0_0 = arith.constant 0 : index
    %c0_1 = arith.constant 0 : index
    %c0_2 = arith.constant 0 : index
    %0 = vector.load %arg3[%c0, %c0_0, %c0_1, %c0_2] : memref<1x1x64x16xf32, #tpu.memory_space<vmem>>, vector<1x1x16x16xf32>
    %1 = vector.shape_cast %0 : vector<1x1x16x16xf32> to vector<1x16x16xf32>
    %c0_3 = arith.constant 0 : index
    %c0_4 = arith.constant 0 : index
    %c16 = arith.constant 16 : index
    %c0_5 = arith.constant 0 : index
    %2 = vector.load %arg3[%c0_3, %c0_4, %c16, %c0_5] : memref<1x1x64x16xf32, #tpu.memory_space<vmem>>, vector<1x1x16x16xf32>
    %3 = vector.shape_cast %2 : vector<1x1x16x16xf32> to vector<1x16x16xf32>
    %4 = arith.addf %1, %3 : vector<1x16x16xf32>
    %c0_6 = arith.constant 0 : index
    %c0_7 = arith.constant 0 : index
    %c32 = arith.constant 32 : index
    %c0_8 = arith.constant 0 : index
    %5 = vector.load %arg3[%c0_6, %c0_7, %c32, %c0_8] : memref<1x1x64x16xf32, #tpu.memory_space<vmem>>, vector<1x1x16x16xf32>
    %6 = vector.shape_cast %5 : vector<1x1x16x16xf32> to vector<1x16x16xf32>
    %7 = arith.addf %4, %6 : vector<1x16x16xf32>
    %c0_9 = arith.constant 0 : index
    %c0_10 = arith.constant 0 : index
    %c48 = arith.constant 48 : index
    %c0_11 = arith.constant 0 : index
    %8 = vector.load %arg3[%c0_9, %c0_10, %c48, %c0_11] : memref<1x1x64x16xf32, #tpu.memory_space<vmem>>, vector<1x1x16x16xf32>
    %9 = vector.shape_cast %8 : vector<1x1x16x16xf32> to vector<1x16x16xf32>
    %10 = arith.addf %7, %9 : vector<1x16x16xf32>
    %c0_12 = arith.constant 0 : index
    %c0_13 = arith.constant 0 : index
    %11 = vector.load %arg4[%c0_12, %c0_13] : memref<32x16xf32, #tpu.memory_space<vmem>>, vector<32x16xf32>
    %c0_14 = arith.constant 0 : index
    %c0_15 = arith.constant 0 : index
    %12 = vector.load %arg5[%c0_14, %c0_15] : memref<16x32xf32, #tpu.memory_space<vmem>>, vector<16x32xf32>
    %13 = vector.shape_cast %10 : vector<1x16x16xf32> to vector<16x16xf32>
    %cst = arith.constant dense<0.000000e+00> : vector<32x16xf32>
    %14 = tpu.matmul %11, %13, %cst {dimension_numbers = #tpu.dot_dimension_numbers<[1], [0], [0], [1], [0, 0, 1, 1], [], []>} : vector<32x16xf32>, vector<16x16xf32>, vector<32x16xf32> -> vector<32x16xf32>
    %cst_16 = arith.constant dense<0.000000e+00> : vector<32x32xf32>
    %15 = tpu.matmul %14, %12, %cst_16 {dimension_numbers = #tpu.dot_dimension_numbers<[1], [0], [0], [1], [0, 0, 1, 1], [], []>} : vector<32x16xf32>, vector<16x32xf32>, vector<32x32xf32> -> vector<32x32xf32>
    %c0_17 = arith.constant 0 : index
    %c0_18 = arith.constant 0 : index
    %c0_19 = arith.constant 0 : index
    %c0_20 = arith.constant 0 : index
    %16 = vector.load %arg6[%c0_17, %c0_18, %c0_19, %c0_20] : memref<1x1x32x32xf32, #tpu.memory_space<vmem>>, vector<1x1x32x32xf32>
    %17 = vector.shape_cast %16 : vector<1x1x32x32xf32> to vector<32x32xf32>
    %18 = vector.shape_cast %15 : vector<32x32xf32> to vector<1x1x32x32xf32>
    tpu.vector_store %arg6[%c0_17, %c0_18, %c0_19, %c0_20], %18 {strides = array<i32>} : memref<1x1x32x32xf32, #tpu.memory_space<vmem>>, vector<1x1x32x32xf32>,
    return
  }
  func.func @transform_0(%arg0: i32, %arg1: i32, %arg2: i32) -> (i32, i32, i32, i32) {
    %c0_i32 = arith.constant 0 : i32
    %c0_i32_0 = arith.constant 0 : i32
    %c0_i32_1 = arith.constant 0 : i32
    return %arg0, %arg1, %c0_i32, %c0_i32_0 : i32, i32, i32, i32
  }
  func.func @transform_1(%arg0: i32, %arg1: i32, %arg2: i32) -> (i32, i32) {
    %c0_i32 = arith.constant 0 : i32
    %c0_i32_0 = arith.constant 0 : i32
    return %arg2, %c0_i32 : i32, i32
  }
  func.func @transform_2(%arg0: i32, %arg1: i32, %arg2: i32) -> (i32, i32) {
    %c0_i32 = arith.constant 0 : i32
    %c0_i32_0 = arith.constant 0 : i32
    %c0_i32_1 = arith.constant 0 : i32
    return %c0_i32, %c0_i32_0 : i32, i32
  }
  func.func @transform_3(%arg0: i32, %arg1: i32, %arg2: i32) -> (i32, i32, i32, i32) {
    %c0_i32 = arith.constant 0 : i32
    %c0_i32_0 = arith.constant 0 : i32
    return %arg0, %arg1, %arg2, %c0_i32 : i32, i32, i32, i32
  }
}

</mosaic_0001>

<bundles_post_ra>
// kernel: tpu_custom_call.1
= control target key start
LH: loop header
LB: loop body
LE: loop exit
PB: predicated region body
PF: predicated region fallthrough
CT: control target
= control target key end

     0   :  { %8 = vsyncpa [#allocation3], 0  ;;  %s983_s0 = inlined_call_operand.vmem [shape: f32[2,2,64,16], index: 0, kind: input, shape index: {}]   ;;  %s984_s1 = inlined_call_operand.vmem [shape: f32[32,16], index: 1, kind: input, shape index: {}]   ;;  %s985_s2 = inlined_call_operand.vmem [shape: f32[16,32], index: 2, kind: input, shape index: {}]   ;;  %s986_s3 = inlined_call_operand.hbm [shape: f32[2,2,32,32], index: 3, kind: output, shape index: {}]  }
   0x1   :  { %10 = vsyncpa [#allocation3 + $0x1], 0  ;;  %s818_s12 = smov 0   ;;  %s820_s13 = smov 0  }
   0x2   :  { %s822_s14 = smov 0   ;;  %s824_s15 = smov 0  }
   0x3   :  { %s826_s16 = smov 0   ;;  %s828_s17 = smov 0  }
   0x4   :  { %s830_s18 = smov 0   ;;  %s832_s19 = smov 0  }
   0x5 LB: > { %s572_s20 = sadd.s32 4294967295, %s793_s19   ;;  %s573_s21 = sadd.s32 4294967294, %s793_s19   ;;  %s793_s19 = sphi %s832_s19, %s16_s19   ;;  %s789_s18 = sphi %s830_s18, %s995_s18   ;;  %s785_s17 = sphi %s828_s17, %s994_s17   ;;  %s781_s16 = sphi %s826_s16, %s993_s16   ;;  %s777_s15 = sphi %s824_s15, %s992_s15   ;;  %s773_s14 = sphi %s822_s14, %s991_s14   ;;  %s769_s13 = sphi %s820_s13, %s990_s13   ;;  %s765_s12 = sphi %s818_s12, %s989_s12  }
   0x6   : > { %s31_s22 = sadd.s32 1, %s785_s17  ;;  %s35_s23 = sadd.s32 1, %s789_s18 }
   0x7   : > { %p33_p0 = scmp.ge.s32.totalorder %s31_s22, 2  ;;  %p131_p1 = scmp.ne.s32.totalorder %s773_s14, %s769_s13 }
   0x8   : > { %p132_p2 = scmp.eq.s32.totalorder %s572_s20, 3  ;;  %p137_p5 = scmp.ne.s32.totalorder %s769_s13, %s765_s12 }
   0x9   : > { %s997_s22 = smov (%p33_p0, %s31_s22), 0  ;;  %s999_s23 = smov (!%p33_p0, %s35_s23), %s789_s18 }
   0xa   : > { %s115_s24 = ssub.s32 %s785_s17, %s997_s22  ;;  %p869_p3 = por %p132_p2, %p131_p1 }
   0xb   : > { %p37_p4 = scmp.ge.s32.totalorder %s999_s23, 2  ;;  %p138_p6 = scmp.eq.s32.totalorder %s573_s21, 3 }
   0xc   : > { %p577_p7 = scmp.ge.s32.totalorder %s793_s19, 1  ;;  %p180_p9 = scmp.lt.s32.totalorder %s793_s19, 5 }
   0xd   : > { %s1001_s23 = smov (%p37_p4, %s999_s23), 0  ;;  %p878_p8 = por %p138_p6, %p137_p5 }
   0xe   : > { %s114_s27 = ssub.s32 %s789_s18, %s1001_s23  ;;  %s121_s28 = sadd.s32 1, %s773_s14 }
   0xf   : > { %s116_s29 = sor.u32 %s115_s24, %s114_s27  ;;  %p181_p10 = pnand %p577_p7, %p180_p9 }
  0x10   : > { %p119_p11 = scmp.eq.s32.totalorder %s116_s29, 0  ;;  %p213_p12 = scmp.lt.s32.totalorder (!%p181_p10), %s781_s16, 1 }
  0x11   : > { %184 = sbr.rel (%p181_p10) target bundleno = 449 (0x1c1), region = 32  ;;  %p215_p13 = scmp.lt.s32.totalorder (!%p181_p10), %s777_s15, 1 }
  0x12   : > { %s887_s30 = scalar_select %p119_p11, %s773_s14, %s121_s28  }
  0x13   : > { %s591_s21 = sshll.u32 (!%p181_p10), %s777_s15, 2 }
  0x16   : > { %v243_v0 = vld [vmem:[%s984_s1] sm:$0xff]  ;;  %vm249_vm0 = vcmask 130048   ;;  %s214_s6 = scalar_select %p213_p12, %s781_s16, 1  ;;  %v244_v15 = vld [vmem:[%s984_s1 + $0x8] sm:$0xff]  ;;  %v245_v16 = vld [vmem:[%s984_s1 + $0x10] sm:$0xff]  ;;  %vm444_vm1 = vcmask 261120  }
  0x17   : > { %612 = vmatprep.mubr.msk.f32.mxu0 %vm249_vm0, %v243_v0  ;;  %s216_s7 = scalar_select %p215_p13, %s777_s15, 1  ;;  %v246_v17 = vld [vmem:[%s984_s1 + $0x18] sm:$0xff]  ;;  %v248_v18 = vld [vmem:[%s985_s2 + $0x8] sm:$0xff]  ;;  %v247_v19 = vld [vmem:[%s985_s2] sm:$0xff] }
  0x18   : > { %s580_s8 = sshll.u32 %s214_s6, 4  ;;  %618 = vmatprep.subr.mxu1 %v248_v18 }
  0x19   : > { %s579_s9 = sshll.u32 %s216_s7, 3  ;;  %619 = vmatpush3.msra.mxu1 %v248_v18 }
  0x1a   : > { %s219_s10 = sadd.s32 %s580_s8, %s579_s9  ;;  %620 = vmatprep.subr.mxu1 %v247_v19  ;;  %s795_s8 = smov [#allocation2]  }
  0x1b   : > { %s581_s11 = sshll.u32 %s219_s10, 3  ;;  %621 = vmatpush3.msra.mxu1 %v247_v19  ;;  %s705_s9 = sshll.u32 %s795_s8, 4  ;;  %s706_s9 = int_to_ptr.vmem [resolvable:$false] %s705_s9 }
  0x1c   : > { %s221_s24 = scalar_lea.vmem %s983_s0, %s581_s11  ;;  %s210_s11 = sand.u32 1, %s769_s13  }
  0x1d   : > { %v230_v1 = vld [vmem:[%s221_s24 + $0x8] sm:$0xff]  ;;  %v232_v2 = vld [vmem:[%s221_s24 + $0x18] sm:$0xff]  ;;  %v229_v5 = vld [vmem:[%s221_s24] sm:$0xff]  ;;  %s578_s20 = sshll.u32 %s210_s11, 5  ;;  %s707_s10 = scalar_lea.vmem %s706_s9, 1024 }
  0x1e   : > { %v236_v3 = vld [vmem:[%s221_s24 + $0x28] sm:$0xff]  ;;  %v234_v4 = vadd.f32 %v232_v2, %v230_v1  ;;  %v231_v6 = vld [vmem:[%s221_s24 + $0x10] sm:$0xff]  ;;  %v240_v7 = vld [vmem:[%s221_s24 + $0x38] sm:$0xff]  ;;  %s212_s28 = scalar_lea.vmem [#allocation2], %s578_s20 }
  0x1f   : > { %v233_v8 = vadd.f32 %v231_v6, %v229_v5  ;;  %v235_v9 = vld [vmem:[%s221_s24 + $0x20] sm:$0xff]  ;;  %v239_v11 = vld [vmem:[%s221_s24 + $0x30] sm:$0xff]  ;;  %s592_s24 = sshll.u32 %s781_s16, 3  ;;  %s467_s29 = sshll.u32 %s212_s28, 4  ;;  %s925_s29 = int_to_ptr.vmem [resolvable:$true] %s467_s29 }
  0x20   : > { %v238_v10 = vadd.f32 %v236_v3, %v234_v4  ;;  %s464_s27 = sadd.s32 %s592_s24, %s591_s21  ;;  %s932_s16 = scalar_lea.sflag [#allocation3], %s210_s11 }
  0x21   : > { %v237_v12 = vadd.f32 %v235_v9, %v233_v8  ;;  %s593_s4 = sshll.u32 %s464_s27, 7  ;;  %s701_s7 = scalar_lea.vmem %s925_s29, 512 }
  0x22   : > { %v242_v13 = vadd.f32 %v240_v7, %v238_v10  ;;  %s930_s15 = scalar_lea.hbm %s986_s3, %s593_s4  ;;  %p702_p0 = scmp.ne.s32.totalorder %s925_s29, %s701_s7 }
  0x23   : > { %v241_v14 = vadd.f32 %v239_v11, %v237_v12  ;;  %p708_p4 = scmp.lt.s32.totalorder %s925_s29, %s706_s9  ;;  %p709_p5 = scmp.lt.s32.totalorder %s707_s10, %s701_s7 }
  0x24   : > { %608 = vmatprep.subr.mxu0 %v242_v13  ;;  %p703_p1 = pnand %p702_p0, %p869_p3 }
  0x25   : > { %609 = vmatpush3.msra.mxu0 %v242_v13  ;;  %p710_p6 = por %p709_p5, %p708_p4 }
  0x26   : > { %610 = vmatprep.subr.mxu0 %v241_v14  ;;  %p704_p2 = pneg %p703_p1 }
  0x27   : > { %611 = vmatpush3.msra.mxu0 %v241_v14 }
  0x28   : > { %613 = vmatmul.mubr.msk.f32.vlgmr.msra.gmra.mxu0 %vm249_vm0, %v244_v15  ;;  %p711_p7 = pnand %p710_p6, %p704_p2 }
  0x29   : > { %615 = vmatprep.mubr.msk.f32.mxu0 %vm249_vm0, %v245_v16 }
  0x2c   : > { %616 = vmatmul.mubr.msk.f32.gmra.mxu0 %vm249_vm0, %v246_v17 }
  0xe8   : > { %v614_v20 = vpop.f32.mrf.mxu0 }
  0xea   : > { %v328_v21 = vpop.f32.mrf.mxu0 }
  0xeb   : > { %622 = vmatprep.mubr.msk.f32.mxu1 %vm249_vm0, %v328_v21 }
  0xec   : > { %v617_v22 = vpop.f32.mrf.mxu0  ;;  %623 = vmatmul.mubr.msk.f32.vlgmr.msra.gmra.mxu1 %vm249_vm0, %v614_v20 }
  0xee   : > { %v338_v23 = vpop.f32.mrf.mxu0 }
  0xef   : > { %625 = vmatprep.mubr.msk.f32.mxu1 %vm249_vm0, %v338_v23 }
  0xf0   : > { %626 = vmatmul.mubr.msk.f32.gmra.mxu1 %vm249_vm0, %v617_v22 }
 0x1ac   : > { %v624_v24 = vpop.f32.mrf.mxu1 }
 0x1ad   : > { %446 = vst.msk [vmem:[%s212_s28 + $0x8] sm:$0xff] %vm444_vm1, %v624_v24 }
 0x1ae   : > { %v425_v25 = vpop.f32.mrf.mxu1 }
 0x1af   : > { %445 = vst.msk [vmem:[%s212_s28] sm:$0xff] %vm444_vm1, %v425_v25 }
 0x1b0   : > { %v627_v26 = vpop.f32.mrf.mxu1 }
 0x1b1   : > { %448 = vst.msk [vmem:[%s212_s28 + $0x18] sm:$0xff] %vm444_vm1, %v627_v26 }
 0x1b2   : > { %v435_v27 = vpop.f32.mrf.mxu1 }
 0x1b3   : > { %447 = vst.msk [vmem:[%s212_s28 + $0x10] sm:$0xff] %vm444_vm1, %v435_v27 }
 0x1b4   : > { %714 = shalt.err (!%p711_p7)
}
 0x1b5   : > { %s715_s11 = scalar_lea.hbm %s930_s15, 512  ;;  %s719_s24 = scalar_lea.hbm %s986_s3, 2048 }
 0x1b6   : > { %p716_p9 = scmp.ne.s32.totalorder %s930_s15, %s715_s11  ;;  %p720_p12 = scmp.lt.s32.totalorder %s930_s15, %s986_s3 }
 0x1b7   : > { %p721_p13 = scmp.lt.s32.totalorder %s719_s24, %s715_s11 }
 0x1b8   : > { %p717_p10 = pnand %p716_p9, %p869_p3 }
 0x1b9   : > { %p722_p0 = por %p721_p13, %p720_p12 }
 0x1ba   : > { %p718_p11 = pneg %p717_p10 }
 0x1bc   : > { %p723_p1 = pnand %p722_p0, %p718_p11 }
 0x1be   : > { %726 = shalt.err (!%p723_p1)
}
 0x1bf   : > { %s796_s4 = smov 128   ;;  %s797_s5 = smov 8  }
 0x1c0   : > { %628 = dma.vmem_to_hbm [thread:$0]  (%p869_p3), %s925_s29, 512, %s930_s15, %s932_s16, %s796_s4, %s796_s4, %s797_s5  }
 0x1c1 PF: > { %p634_p2 = scmp.ge.s32.totalorder %s793_s19, 2  ;;  %s482_s6 = sand.u32 1, %s765_s12  }
 0x1c2   : > { %s483_s7 = scalar_lea.sflag [#allocation3], %s482_s6 }
 0x1c3   : > { %p631_p4 = pnand %p634_p2, %p878_p8 }
 0x1c5   : > { %p632_p5 = pneg %p631_p4 }
 0x1c7   : > { %760 = dma.done.wait (%p632_p5), %s483_s7, 512  }
 0x1c8   : > { %762 = vsyncadd (%p632_p5), %s483_s7, 4294966784  ;;  %s16_s19 = sadd.s32 1, %s793_s19   ;;  %s989_s12 = smov %s769_s13 }
 0x1c9   : > { %p13_p6 = scmp.ge.s32.totalorder %s16_s19, 6   ;;  %s990_s13 = smov %s773_s14 }
 0x1ca   : > { %s991_s14 = smov %s887_s30  ;;  %s992_s15 = smov %s785_s17 }
 0x1cb   : > { %s993_s16 = smov %s789_s18  ;;  %s994_s17 = smov %s997_s22 }
 0x1cc   : > { %s995_s18 = smov %s1001_s23  ;;  %15 = sbr.rel (!%p13_p6) target bundleno = 5 (0x5), region = 70 }
 0x1d1   :  { %488 = vsyncpa [#allocation3], 1 }
 0x1d2   :  { %490 = vsyncpa [#allocation3 + $0x1], 1 }

</bundles_post_ra>
